<compile_context>
chip_gen: v7x
topology: tpu7x:2x2x1
jax: 0.10.0
libtpu: 0.0.40
codegen_flags: <defaults>
</compile_context>

<pallas_src>
import numpy as np
import jax
import jax.numpy as jnp
from jax.experimental import pallas as pl
from jax.experimental.pallas import tpu as pltpu


# ---------------------------------------------------------------------------
# Static pooling / selection constants (computed once in numpy at trace time)
# ---------------------------------------------------------------------------
def _pool_constants(in_size=128, out_size=100, grid8=8, lane_pad=128, row_pad=104):
    up = in_size // grid8  # 16x replication factor (4 chained 2x nearest upsamples)
    i = np.arange(out_size)
    starts = (i * in_size) // out_size                       # floor(i*in/out)
    ends = ((i + 1) * in_size + out_size - 1) // out_size    # ceil((i+1)*in/out)
    lo = (starts // up).astype(np.int64)                     # first source cell (0..7)
    hi = ((ends - 1) // up).astype(np.int64)                 # last source cell (0..7)

    k = np.arange(grid8 * grid8)                             # flat 8x8 index, k = r*8 + c
    # mask[k, j] = 1 iff k % 8 == j  -> scatters the flat (64,1) values into (64,8)
    mask = (k[:, None] % grid8 == np.arange(grid8)[None, :]).astype(np.float32)
    # selrow_*[oi, k] = 1 iff k // 8 == row_candidate(oi); sublane-padded to 104 rows
    selrow_lo = np.zeros((row_pad, grid8 * grid8), np.float32)
    selrow_hi = np.zeros((row_pad, grid8 * grid8), np.float32)
    selrow_lo[:out_size] = (k[None, :] // grid8 == lo[:, None])
    selrow_hi[:out_size] = (k[None, :] // grid8 == hi[:, None])
    # csel_*[c8, oj] = 1 iff c8 == col_candidate(oj); padded to 128 lanes (extra cols = 0)
    csel_lo = np.zeros((grid8, lane_pad), np.float32)
    csel_lo[lo, np.arange(out_size)] = 1.0
    csel_hi = np.zeros((grid8, lane_pad), np.float32)
    csel_hi[hi, np.arange(out_size)] = 1.0

    return (jnp.asarray(mask), jnp.asarray(selrow_lo), jnp.asarray(selrow_hi),
            jnp.asarray(csel_lo), jnp.asarray(csel_hi))


# ---------------------------------------------------------------------------
# Single fused kernel: conv1..conv4 + adaptive max pool + conv5 + sigmoid
# ---------------------------------------------------------------------------
def _decoder_fused_kernel(x_ref, w1_ref, b1_ref, w2_ref, b2_ref, w3_ref, b3_ref,
                          scal_ref, mask_ref, rlo_ref, rhi_ref, clo_ref, chi_ref,
                          o_ref):
    f32 = jnp.float32
    h = x_ref[...]                                                           # (64, 48)
    # conv1..conv3 as MXU matmuls (per-pixel channel mixes), bias + ReLU fused
    h = jnp.maximum(jnp.dot(h, w1_ref[...], preferred_element_type=f32) + b1_ref[...], 0.0)
    h = jnp.maximum(jnp.dot(h, w2_ref[...], preferred_element_type=f32) + b2_ref[...], 0.0)
    h = jnp.maximum(jnp.dot(h, w3_ref[...], preferred_element_type=f32) + b3_ref[...], 0.0)

    # packed tail params: lanes 0..15 = w4, 16 = b4, 17 = w5, 18 = b5
    s = scal_ref[...]                                                        # (1, 128)
    w4 = s[:, 0:16]                                                          # (1, 16)
    b4 = s[0, 16]
    w5 = s[0, 17]
    b5 = s[0, 18]

    # conv4 (16 -> 1) on VPU/XLU: broadcast-mul by the 16 weights + lane reduce
    v = jnp.maximum(jnp.sum(h * w4, axis=-1, keepdims=True) + b4, 0.0)       # (64, 1)
    # scatter the flat 8x8 values into an 8-col matrix: vmat[r*8+c, c] = v8[r, c]
    vmat = v * mask_ref[...]                                                 # (64, 8)
    # separable adaptive max pool via exact 0/1 selection matmuls (values are >= 0)
    rows_lo = jnp.dot(rlo_ref[...], vmat, preferred_element_type=f32)        # (104, 8)
    rows_hi = jnp.dot(rhi_ref[...], vmat, preferred_element_type=f32)        # (104, 8)
    rmax = jnp.maximum(rows_lo, rows_hi)                                     # (104, 8)
    cols_lo = jnp.dot(rmax, clo_ref[...], preferred_element_type=f32)        # (104, 128)
    cols_hi = jnp.dot(rmax, chi_ref[...], preferred_element_type=f32)        # (104, 128)
    pooled = jnp.maximum(cols_lo, cols_hi)                                   # (104, 128)
    # conv5 (1 -> 1) is a scalar affine; sigmoid via EUP exp + approx reciprocal
    y = w5 * pooled + b5
    o_ref[...] = pl.reciprocal(1.0 + jnp.exp(-y), approx=True)


def _const2(b):
    return (0, 0)


@jax.jit
def decoder_forward(params, x):
    """x: (B, 64, 48) float32 -> (B, 1, 100, 100) float32."""
    B = x.shape[0]
    # NOTE: x[b] (64, 48) with row = i*8 + j, col = channel is exactly the NHWC-flattened
    # 8x8 activation implied by x.permute(0, 2, 1).view(B, 48, 8, 8) -> no transposes.
    mask, selrow_lo, selrow_hi, csel_lo, csel_hi = _pool_constants()

    (w1, b1), (w2, b2), (w3, b3), (w4, b4), (w5, b5) = (
        params["cnv1"], params["cnv2"], params["cnv3"], params["cnv4"], params["cnv5"])

    # pack the tiny tail parameters into one lane-dense row: [w4(16), b4, w5, b5, 0...]
    scal = jnp.zeros((1, 128), jnp.float32)
    scal = scal.at[0, 0:16].set(w4.reshape(16))
    scal = scal.at[0, 16].set(b4.reshape(())[()])
    scal = scal.at[0, 17].set(w5.reshape(())[()])
    scal = scal.at[0, 18].set(b5.reshape(())[()])

    out_pad = pl.pallas_call(
        _decoder_fused_kernel,
        out_shape=jax.ShapeDtypeStruct((B, 104, 128), jnp.float32),
        grid=(B,),
        in_specs=[
            pl.BlockSpec((None, 64, 48), lambda b: (b, 0, 0)),   # activations (per batch)
            pl.BlockSpec((48, 48), _const2),                     # w1
            pl.BlockSpec((1, 48), _const2),                      # b1
            pl.BlockSpec((48, 32), _const2),                     # w2
            pl.BlockSpec((1, 32), _const2),                      # b2
            pl.BlockSpec((32, 16), _const2),                     # w3
            pl.BlockSpec((1, 16), _const2),                      # b3
            pl.BlockSpec((1, 128), _const2),                     # packed w4/b4/w5/b5
            pl.BlockSpec((64, 8), _const2),                      # flat->8x8 scatter mask
            pl.BlockSpec((104, 64), _const2),                    # row-selection (lo)
            pl.BlockSpec((104, 64), _const2),                    # row-selection (hi)
            pl.BlockSpec((8, 128), _const2),                     # col-selection (lo)
            pl.BlockSpec((8, 128), _const2),                     # col-selection (hi)
        ],
        out_specs=pl.BlockSpec((None, 104, 128), lambda b: (b, 0, 0)),
        compiler_params=pltpu.CompilerParams(dimension_semantics=("parallel",)),
    )(x, w1, b1.reshape(1, 48), w2, b2.reshape(1, 32), w3, b3.reshape(1, 16),
      scal, mask, selrow_lo, selrow_hi, csel_lo, csel_hi)

    # drop sublane/lane padding (kernel output is fully tile-dense; slice is tiny)
    return out_pad[:, :100, :100].reshape(B, 1, 100, 100)


# ---------------------------------------------------------------------------
# Parameter init (matches PyTorch Conv2d defaults for 1x1 kernels)
# ---------------------------------------------------------------------------
def init_params(key):
    def conv_init(k, cin, cout):
        k1, k2 = jax.random.split(k)
        bound = 1.0 / np.sqrt(cin)
        w = jax.random.uniform(k1, (cin, cout), jnp.float32, -bound, bound)
        b = jax.random.uniform(k2, (cout,), jnp.float32, -bound, bound)
        return w, b

    ks = jax.random.split(key, 5)
    return {
        "cnv1": conv_init(ks[0], 48, 48),
        "cnv2": conv_init(ks[1], 48, 32),
        "cnv3": conv_init(ks[2], 32, 16),
        "cnv4": conv_init(ks[3], 16, 1),
        "cnv5": conv_init(ks[4], 1, 1),
    }


# ---------------------------------------------------------------------------
# Pure-JAX reference (follows the PyTorch graph literally: upsample between convs)
# ---------------------------------------------------------------------------
def decoder_reference(params, x):
    B = x.shape[0]
    h = jnp.transpose(x, (0, 2, 1)).reshape(B, 48, 8, 8)   # NCHW

    def up2(z):
        return jnp.repeat(jnp.repeat(z, 2, axis=2), 2, axis=3)

    def conv(z, wb):
        w, b = wb
        return jnp.einsum("bchw,cd->bdhw", z, w) + b[None, :, None, None]

    h = jax.nn.relu(conv(up2(h), params["cnv1"]))           # (B,48,16,16)
    h = jax.nn.relu(conv(up2(h), params["cnv2"]))           # (B,32,32,32)
    h = jax.nn.relu(conv(up2(h), params["cnv3"]))           # (B,16,64,64)
    h = jax.nn.relu(conv(up2(h), params["cnv4"]))           # (B,1,128,128)

    plane = h[:, 0]                                          # (B,128,128)
    i = np.arange(100)
    starts = (i * 128) // 100
    ends = ((i + 1) * 128 + 99) // 100
    idx = np.stack([starts, np.minimum(starts + 1, ends - 1), ends - 1], axis=1)  # (100,3)
    r = plane[:, idx, :].max(axis=2)                         # (B,100,128)
    pooled = r[:, :, idx].max(axis=3)                        # (B,100,100)

    w5, b5 = params["cnv5"]
    y = jax.nn.sigmoid(w5[0, 0] * pooled + b5[0])
    return y[:, None]


if __name__ == "__main__":
    key = jax.random.PRNGKey(0)
    pk, xk = jax.random.split(key)
    params = init_params(pk)
    x = jax.random.normal(xk, (2, 64, 48), jnp.float32)

    out = jax.block_until_ready(decoder_forward(params, x))
    assert out.shape == (2, 1, 100, 100), out.shape
    assert bool(jnp.all(jnp.isfinite(out)))

    ref = jax.block_until_ready(decoder_reference(params, x))
    max_err = float(jnp.max(jnp.abs(out - ref)))
    assert max_err < 2e-2, max_err   # loose: approx reciprocal + MXU f32 precision

    print("KERNEL_OK")
</pallas_src>

<mosaic_0001>
module attributes {stable_mosaic.version = 11 : i64} {
  func.func @_decoder_fused_kernel(%arg0: i32, %arg1: memref<1x64x48xf32, #tpu.memory_space<vmem>>, %arg2: memref<48x48xf32, #tpu.memory_space<vmem>>, %arg3: memref<1x48xf32, #tpu.memory_space<vmem>>, %arg4: memref<48x32xf32, #tpu.memory_space<vmem>>, %arg5: memref<1x32xf32, #tpu.memory_space<vmem>>, %arg6: memref<32x16xf32, #tpu.memory_space<vmem>>, %arg7: memref<1x16xf32, #tpu.memory_space<vmem>>, %arg8: memref<1x128xf32, #tpu.memory_space<vmem>>, %arg9: memref<64x8xf32, #tpu.memory_space<vmem>>, %arg10: memref<104x64xf32, #tpu.memory_space<vmem>>, %arg11: memref<104x64xf32, #tpu.memory_space<vmem>>, %arg12: memref<8x128xf32, #tpu.memory_space<vmem>>, %arg13: memref<8x128xf32, #tpu.memory_space<vmem>>, %arg14: memref<1x104x128xf32, #tpu.memory_space<vmem>>) attributes {dimension_semantics = [#tpu.dimension_semantics<parallel>], iteration_bounds = array<i64: 2>, scalar_prefetch = 0 : i64, scratch_operands = 0 : i64, tpu.core_type = #tpu.core_type<tc>, window_params = [{transform_indices = @transform_0, window_bounds = array<i64: 1, 64, 48>}, {pipeline_mode = #tpu.pipeline_mode<synchronous>, transform_indices = @transform_1, window_bounds = array<i64: 48, 48>}, {pipeline_mode = #tpu.pipeline_mode<synchronous>, transform_indices = @transform_2, window_bounds = array<i64: 1, 48>}, {pipeline_mode = #tpu.pipeline_mode<synchronous>, transform_indices = @transform_3, window_bounds = array<i64: 48, 32>}, {pipeline_mode = #tpu.pipeline_mode<synchronous>, transform_indices = @transform_4, window_bounds = array<i64: 1, 32>}, {pipeline_mode = #tpu.pipeline_mode<synchronous>, transform_indices = @transform_5, window_bounds = array<i64: 32, 16>}, {pipeline_mode = #tpu.pipeline_mode<synchronous>, transform_indices = @transform_6, window_bounds = array<i64: 1, 16>}, {pipeline_mode = #tpu.pipeline_mode<synchronous>, transform_indices = @transform_7, window_bounds = array<i64: 1, 128>}, {pipeline_mode = #tpu.pipeline_mode<synchronous>, transform_indices = @transform_8, window_bounds = array<i64: 64, 8>}, {pipeline_mode = #tpu.pipeline_mode<synchronous>, transform_indices = @transform_9, window_bounds = array<i64: 104, 64>}, {pipeline_mode = #tpu.pipeline_mode<synchronous>, transform_indices = @transform_10, window_bounds = array<i64: 104, 64>}, {pipeline_mode = #tpu.pipeline_mode<synchronous>, transform_indices = @transform_11, window_bounds = array<i64: 8, 128>}, {pipeline_mode = #tpu.pipeline_mode<synchronous>, transform_indices = @transform_12, window_bounds = array<i64: 8, 128>}, {transform_indices = @transform_13, window_bounds = array<i64: 1, 104, 128>}]} {
    %c0 = arith.constant 0 : index
    %c0_0 = arith.constant 0 : index
    %c0_1 = arith.constant 0 : index
    %0 = vector.load %arg1[%c0, %c0_0, %c0_1] : memref<1x64x48xf32, #tpu.memory_space<vmem>>, vector<1x64x48xf32>
    %1 = vector.shape_cast %0 : vector<1x64x48xf32> to vector<64x48xf32>
    %c0_2 = arith.constant 0 : index
    %c0_3 = arith.constant 0 : index
    %2 = vector.load %arg2[%c0_2, %c0_3] : memref<48x48xf32, #tpu.memory_space<vmem>>, vector<48x48xf32>
    %cst = arith.constant dense<0.000000e+00> : vector<64x48xf32>
    %3 = tpu.matmul %1, %2, %cst {dimension_numbers = #tpu.dot_dimension_numbers<[1], [0], [0], [1], [0, 0, 1, 1], [], []>} : vector<64x48xf32>, vector<48x48xf32>, vector<64x48xf32> -> vector<64x48xf32>
    %c0_4 = arith.constant 0 : index
    %c0_5 = arith.constant 0 : index
    %4 = vector.load %arg3[%c0_4, %c0_5] : memref<1x48xf32, #tpu.memory_space<vmem>>, vector<1x48xf32>
    %5 = vector.broadcast %4 : vector<1x48xf32> to vector<64x48xf32>
    %6 = arith.addf %3, %5 : vector<64x48xf32>
    %cst_6 = arith.constant 0.000000e+00 : f32
    %7 = vector.broadcast %cst_6 : f32 to vector<64x48xf32>
    %8 = arith.maximumf %6, %7 : vector<64x48xf32>
    %c0_7 = arith.constant 0 : index
    %c0_8 = arith.constant 0 : index
    %9 = vector.load %arg4[%c0_7, %c0_8] : memref<48x32xf32, #tpu.memory_space<vmem>>, vector<48x32xf32>
    %cst_9 = arith.constant dense<0.000000e+00> : vector<64x32xf32>
    %10 = tpu.matmul %8, %9, %cst_9 {dimension_numbers = #tpu.dot_dimension_numbers<[1], [0], [0], [1], [0, 0, 1, 1], [], []>} : vector<64x48xf32>, vector<48x32xf32>, vector<64x32xf32> -> vector<64x32xf32>
    %c0_10 = arith.constant 0 : index
    %c0_11 = arith.constant 0 : index
    %11 = vector.load %arg5[%c0_10, %c0_11] : memref<1x32xf32, #tpu.memory_space<vmem>>, vector<1x32xf32>
    %12 = vector.broadcast %11 : vector<1x32xf32> to vector<64x32xf32>
    %13 = arith.addf %10, %12 : vector<64x32xf32>
    %cst_12 = arith.constant 0.000000e+00 : f32
    %14 = vector.broadcast %cst_12 : f32 to vector<64x32xf32>
    %15 = arith.maximumf %13, %14 : vector<64x32xf32>
    %c0_13 = arith.constant 0 : index
    %c0_14 = arith.constant 0 : index
    %16 = vector.load %arg6[%c0_13, %c0_14] : memref<32x16xf32, #tpu.memory_space<vmem>>, vector<32x16xf32>
    %cst_15 = arith.constant dense<0.000000e+00> : vector<64x16xf32>
    %17 = tpu.matmul %15, %16, %cst_15 {dimension_numbers = #tpu.dot_dimension_numbers<[1], [0], [0], [1], [0, 0, 1, 1], [], []>} : vector<64x32xf32>, vector<32x16xf32>, vector<64x16xf32> -> vector<64x16xf32>
    %c0_16 = arith.constant 0 : index
    %c0_17 = arith.constant 0 : index
    %18 = vector.load %arg7[%c0_16, %c0_17] : memref<1x16xf32, #tpu.memory_space<vmem>>, vector<1x16xf32>
    %19 = vector.broadcast %18 : vector<1x16xf32> to vector<64x16xf32>
    %20 = arith.addf %17, %19 : vector<64x16xf32>
    %cst_18 = arith.constant 0.000000e+00 : f32
    %21 = vector.broadcast %cst_18 : f32 to vector<64x16xf32>
    %22 = arith.maximumf %20, %21 : vector<64x16xf32>
    %c0_19 = arith.constant 0 : index
    %c0_20 = arith.constant 0 : index
    %23 = vector.load %arg8[%c0_19, %c0_20] : memref<1x128xf32, #tpu.memory_space<vmem>>, vector<1x128xf32>
    %24 = vector.extract_strided_slice %23 {offsets = [0, 0], sizes = [1, 16], strides = [1, 1]} : vector<1x128xf32> to vector<1x16xf32>
    %25 = vector.extract_strided_slice %23 {offsets = [0, 16], sizes = [1, 1], strides = [1, 1]} : vector<1x128xf32> to vector<1x1xf32>
    %26 = vector.extract %25[0, 0] : f32 from vector<1x1xf32>
    %27 = vector.extract_strided_slice %23 {offsets = [0, 17], sizes = [1, 1], strides = [1, 1]} : vector<1x128xf32> to vector<1x1xf32>
    %28 = vector.extract %27[0, 0] : f32 from vector<1x1xf32>
    %29 = vector.extract_strided_slice %23 {offsets = [0, 18], sizes = [1, 1], strides = [1, 1]} : vector<1x128xf32> to vector<1x1xf32>
    %30 = vector.extract %29[0, 0] : f32 from vector<1x1xf32>
    %31 = vector.broadcast %24 : vector<1x16xf32> to vector<64x16xf32>
    %32 = arith.mulf %22, %31 : vector<64x16xf32>
    %cst_21 = arith.constant dense<0.000000e+00> : vector<64xf32>
    %33 = vector.multi_reduction <add>, %32, %cst_21 [1] : vector<64x16xf32> to vector<64xf32>
    %34 = vector.shape_cast %33 : vector<64xf32> to vector<64x1xf32>
    %35 = vector.broadcast %26 : f32 to vector<64x1xf32>
    %36 = arith.addf %34, %35 : vector<64x1xf32>
    %cst_22 = arith.constant 0.000000e+00 : f32
    %37 = vector.broadcast %cst_22 : f32 to vector<64x1xf32>
    %38 = arith.maximumf %36, %37 : vector<64x1xf32>
    %c0_23 = arith.constant 0 : index
    %c0_24 = arith.constant 0 : index
    %39 = vector.load %arg9[%c0_23, %c0_24] : memref<64x8xf32, #tpu.memory_space<vmem>>, vector<64x8xf32>
    %40 = vector.broadcast %38 : vector<64x1xf32> to vector<64x8xf32>
    %41 = arith.mulf %40, %39 : vector<64x8xf32>
    %c0_25 = arith.constant 0 : index
    %c0_26 = arith.constant 0 : index
    %42 = vector.load %arg10[%c0_25, %c0_26] : memref<104x64xf32, #tpu.memory_space<vmem>>, vector<104x64xf32>
    %cst_27 = arith.constant dense<0.000000e+00> : vector<104x8xf32>
    %43 = tpu.matmul %42, %41, %cst_27 {dimension_numbers = #tpu.dot_dimension_numbers<[1], [0], [0], [1], [0, 0, 1, 1], [], []>} : vector<104x64xf32>, vector<64x8xf32>, vector<104x8xf32> -> vector<104x8xf32>
    %c0_28 = arith.constant 0 : index
    %c0_29 = arith.constant 0 : index
    %44 = vector.load %arg11[%c0_28, %c0_29] : memref<104x64xf32, #tpu.memory_space<vmem>>, vector<104x64xf32>
    %cst_30 = arith.constant dense<0.000000e+00> : vector<104x8xf32>
    %45 = tpu.matmul %44, %41, %cst_30 {dimension_numbers = #tpu.dot_dimension_numbers<[1], [0], [0], [1], [0, 0, 1, 1], [], []>} : vector<104x64xf32>, vector<64x8xf32>, vector<104x8xf32> -> vector<104x8xf32>
    %46 = arith.maximumf %43, %45 : vector<104x8xf32>
    %c0_31 = arith.constant 0 : index
    %c0_32 = arith.constant 0 : index
    %47 = vector.load %arg12[%c0_31, %c0_32] : memref<8x128xf32, #tpu.memory_space<vmem>>, vector<8x128xf32>
    %cst_33 = arith.constant dense<0.000000e+00> : vector<104x128xf32>
    %48 = tpu.matmul %46, %47, %cst_33 {dimension_numbers = #tpu.dot_dimension_numbers<[1], [0], [0], [1], [0, 0, 1, 1], [], []>} : vector<104x8xf32>, vector<8x128xf32>, vector<104x128xf32> -> vector<104x128xf32>
    %c0_34 = arith.constant 0 : index
    %c0_35 = arith.constant 0 : index
    %49 = vector.load %arg13[%c0_34, %c0_35] : memref<8x128xf32, #tpu.memory_space<vmem>>, vector<8x128xf32>
    %cst_36 = arith.constant dense<0.000000e+00> : vector<104x128xf32>
    %50 = tpu.matmul %46, %49, %cst_36 {dimension_numbers = #tpu.dot_dimension_numbers<[1], [0], [0], [1], [0, 0, 1, 1], [], []>} : vector<104x8xf32>, vector<8x128xf32>, vector<104x128xf32> -> vector<104x128xf32>
    %51 = arith.maximumf %48, %50 : vector<104x128xf32>
    %52 = vector.broadcast %28 : f32 to vector<104x128xf32>
    %53 = arith.mulf %52, %51 : vector<104x128xf32>
    %54 = vector.broadcast %30 : f32 to vector<104x128xf32>
    %55 = arith.addf %53, %54 : vector<104x128xf32>
    %cst_37 = arith.constant 0.000000e+00 : f32
    %56 = vector.broadcast %cst_37 : f32 to vector<104x128xf32>
    %57 = arith.subf %56, %55 : vector<104x128xf32>
    %58 = math.exp %57 : vector<104x128xf32>
    %cst_38 = arith.constant 1.000000e+00 : f32
    %59 = vector.broadcast %cst_38 : f32 to vector<104x128xf32>
    %60 = arith.addf %59, %58 : vector<104x128xf32>
    %61 = tpu.reciprocal %60 {approx = true} : vector<104x128xf32> -> vector<104x128xf32>
    %c0_39 = arith.constant 0 : index
    %c0_40 = arith.constant 0 : index
    %c0_41 = arith.constant 0 : index
    %62 = vector.load %arg14[%c0_39, %c0_40, %c0_41] : memref<1x104x128xf32, #tpu.memory_space<vmem>>, vector<1x104x128xf32>
    %63 = vector.shape_cast %62 : vector<1x104x128xf32> to vector<104x128xf32>
    %64 = vector.shape_cast %61 : vector<104x128xf32> to vector<1x104x128xf32>
    tpu.vector_store %arg14[%c0_39, %c0_40, %c0_41], %64 {strides = array<i32>} : memref<1x104x128xf32, #tpu.memory_space<vmem>>, vector<1x104x128xf32>,
    return
  }
  func.func @transform_0(%arg0: i32) -> (i32, i32, i32) {
    %c0_i32 = arith.constant 0 : i32
    %c0_i32_0 = arith.constant 0 : i32
    %c0_i32_1 = arith.constant 0 : i32
    return %arg0, %c0_i32, %c0_i32_0 : i32, i32, i32
  }
  func.func @transform_1(%arg0: i32) -> (i32, i32) {
    %c0_i32 = arith.constant 0 : i32
    %c0_i32_0 = arith.constant 0 : i32
    %c0_i32_1 = arith.constant 0 : i32
    return %c0_i32, %c0_i32_0 : i32, i32
  }
  func.func @transform_2(%arg0: i32) -> (i32, i32) {
    %c0_i32 = arith.constant 0 : i32
    %c0_i32_0 = arith.constant 0 : i32
    %c0_i32_1 = arith.constant 0 : i32
    return %c0_i32, %c0_i32_0 : i32, i32
  }
  func.func @transform_3(%arg0: i32) -> (i32, i32) {
    %c0_i32 = arith.constant 0 : i32
    %c0_i32_0 = arith.constant 0 : i32
    %c0_i32_1 = arith.constant 0 : i32
    return %c0_i32, %c0_i32_0 : i32, i32
  }
  func.func @transform_4(%arg0: i32) -> (i32, i32) {
    %c0_i32 = arith.constant 0 : i32
    %c0_i32_0 = arith.constant 0 : i32
    %c0_i32_1 = arith.constant 0 : i32
    return %c0_i32, %c0_i32_0 : i32, i32
  }
  func.func @transform_5(%arg0: i32) -> (i32, i32) {
    %c0_i32 = arith.constant 0 : i32
    %c0_i32_0 = arith.constant 0 : i32
    %c0_i32_1 = arith.constant 0 : i32
    return %c0_i32, %c0_i32_0 : i32, i32
  }
  func.func @transform_6(%arg0: i32) -> (i32, i32) {
    %c0_i32 = arith.constant 0 : i32
    %c0_i32_0 = arith.constant 0 : i32
    %c0_i32_1 = arith.constant 0 : i32
    return %c0_i32, %c0_i32_0 : i32, i32
  }
  func.func @transform_7(%arg0: i32) -> (i32, i32) {
    %c0_i32 = arith.constant 0 : i32
    %c0_i32_0 = arith.constant 0 : i32
    %c0_i32_1 = arith.constant 0 : i32
    return %c0_i32, %c0_i32_0 : i32, i32
  }
  func.func @transform_8(%arg0: i32) -> (i32, i32) {
    %c0_i32 = arith.constant 0 : i32
    %c0_i32_0 = arith.constant 0 : i32
    %c0_i32_1 = arith.constant 0 : i32
    return %c0_i32, %c0_i32_0 : i32, i32
  }
  func.func @transform_9(%arg0: i32) -> (i32, i32) {
    %c0_i32 = arith.constant 0 : i32
    %c0_i32_0 = arith.constant 0 : i32
    %c0_i32_1 = arith.constant 0 : i32
    return %c0_i32, %c0_i32_0 : i32, i32
  }
  func.func @transform_10(%arg0: i32) -> (i32, i32) {
    %c0_i32 = arith.constant 0 : i32
    %c0_i32_0 = arith.constant 0 : i32
    %c0_i32_1 = arith.constant 0 : i32
    return %c0_i32, %c0_i32_0 : i32, i32
  }
  func.func @transform_11(%arg0: i32) -> (i32, i32) {
    %c0_i32 = arith.constant 0 : i32
    %c0_i32_0 = arith.constant 0 : i32
    %c0_i32_1 = arith.constant 0 : i32
    return %c0_i32, %c0_i32_0 : i32, i32
  }
  func.func @transform_12(%arg0: i32) -> (i32, i32) {
    %c0_i32 = arith.constant 0 : i32
    %c0_i32_0 = arith.constant 0 : i32
    %c0_i32_1 = arith.constant 0 : i32
    return %c0_i32, %c0_i32_0 : i32, i32
  }
  func.func @transform_13(%arg0: i32) -> (i32, i32, i32) {
    %c0_i32 = arith.constant 0 : i32
    %c0_i32_0 = arith.constant 0 : i32
    %c0_i32_1 = arith.constant 0 : i32
    return %arg0, %c0_i32, %c0_i32_0 : i32, i32, i32
  }
}

</mosaic_0001>

<bundles_post_ra>
// kernel: decoder_forward.1
= control target key start
LH: loop header
LB: loop body
LE: loop exit
PB: predicated region body
PF: predicated region fallthrough
CT: control target
= control target key end

     0   :  { %s2516_s25 = smov 0   ;;  %s2958_s0 = inlined_call_operand.vmem [shape: f32[2,64,48], index: 0, kind: input, shape index: {}]   ;;  %s2959_s1 = inlined_call_operand.vmem [shape: f32[48,48], index: 1, kind: input, shape index: {}]   ;;  %s2960_s2 = inlined_call_operand.vmem [shape: f32[1,48], index: 2, kind: input, shape index: {}]   ;;  %s2961_s3 = inlined_call_operand.vmem [shape: f32[48,32], index: 3, kind: input, shape index: {}]   ;;  %s2962_s4 = inlined_call_operand.vmem [shape: f32[1,32], index: 4, kind: input, shape index: {}]   ;;  %s2963_s5 = inlined_call_operand.vmem [shape: f32[32,16], index: 5, kind: input, shape index: {}]   ;;  %s2964_s6 = inlined_call_operand.vmem [shape: f32[1,16], index: 6, kind: input, shape index: {}]   ;;  %s2965_s7 = inlined_call_operand.vmem [shape: f32[1,128], index: 7, kind: input, shape index: {}]   ;;  %s2966_s8 = inlined_call_operand.vmem [shape: f32[64,8], index: 8, kind: input, shape index: {}]   ;;  %s2967_s9 = inlined_call_operand.vmem [shape: f32[104,64], index: 9, kind: input, shape index: {}]   ;;  %s2968_s10 = inlined_call_operand.vmem [shape: f32[104,64], index: 10, kind: input, shape index: {}]   ;;  %s2969_s11 = inlined_call_operand.vmem [shape: f32[8,128], index: 11, kind: input, shape index: {}]   ;;  %s2970_s12 = inlined_call_operand.vmem [shape: f32[8,128], index: 12, kind: input, shape index: {}]   ;;  %s2971_s13 = inlined_call_operand.vmem [shape: f32[2,104,128], index: 13, kind: output, shape index: {}]  }
   0x1 LB: > { %s1835_s26 = sadd.s32 4294967295, %s2438_s25   ;;  %p1839_p0 = scmp.ge.s32.totalorder %s2438_s25, 1  ;;  %s2438_s25 = sphi %s2516_s25, %s23_s25  }
   0x2   : > { %p387_p1 = scmp.lt.s32.totalorder %s2438_s25, 3 }
   0x4   : > { %p388_p2 = pnand %p1839_p0, %p387_p1 }
   0x5   : > { %v449_v0 = vld [vmem:[%s2959_s1] sm:$0xff] (!%p388_p2)  ;;  %v450_v1 = vld [vmem:[%s2959_s1 + $0x8] sm:$0xff] (!%p388_p2)  ;;  %v451_v2 = vld [vmem:[%s2959_s1 + $0x10] sm:$0xff] (!%p388_p2)  ;;  %p431_p3 = scmp.lt.s32.totalorder (!%p388_p2), %s1835_s26, 1  ;;  %vm462_vm0 = vcmask (!%p388_p2), 392192   ;;  %s2440_s20 = smov (!%p388_p2), 112  }
   0x6   : > { %391 = sbr.rel (%p388_p2) target bundleno = 1369 (0x559), region = 72  ;;  %v2295_v3 = vpack.c.bf16 (!%p388_p2), %v450_v1, %v449_v0  ;;  %v452_v4 = vld [vmem:[%s2959_s1 + $0x18] sm:$0xff] (!%p388_p2)  ;;  %v453_v5 = vld [vmem:[%s2959_s1 + $0x20] sm:$0xff] (!%p388_p2)  ;;  %v454_v6 = vld [vmem:[%s2959_s1 + $0x28] sm:$0xff] (!%p388_p2)  ;;  %vm761_vm1 = vcmask (!%p388_p2), 261120   ;;  %vm923_vm2 = vcmask (!%p388_p2), 130048  }
   0x7   : > { %v2299_v7 = vpack.c.bf16 (!%p388_p2), %v452_v4, %v451_v2  ;;  %v600_v8 = vld [vmem:[%s2961_s3] sm:$0xff] (!%p388_p2)  ;;  %v601_v9 = vld [vmem:[%s2961_s3 + $0x8] sm:$0xff] (!%p388_p2)  ;;  %v602_v10 = vld [vmem:[%s2961_s3 + $0x10] sm:$0xff] (!%p388_p2)  ;;  %v2303_v14 = vpack.c.bf16 (!%p388_p2), %v454_v6, %v453_v5  ;;  %vm2442_vm3 = vmmov (!%p388_p2), 0   ;;  %vm994_vm4 = vcmask (!%p388_p2), 523264   ;;  %s2444_s23 = smov (!%p388_p2), 111  }
   0x8   : > { %2296 = vmatprep.subr.bf16.mxu0 (!%p388_p2), %v2295_v3  ;;  %v2307_v11 = vpack.c.bf16 (!%p388_p2), %v601_v9, %v600_v8  ;;  %v603_v12 = vld [vmem:[%s2961_s3 + $0x18] sm:$0xff] (!%p388_p2)  ;;  %v604_v23 = vld [vmem:[%s2961_s3 + $0x20] sm:$0xff] (!%p388_p2)  ;;  %v605_v24 = vld [vmem:[%s2961_s3 + $0x28] sm:$0xff] (!%p388_p2)  ;;  %s2445_s24 = smov (!%p388_p2), 110   ;;  %vm1360_vm5 = vcmask (!%p388_p2), 64512  }
   0x9   : > { %2298 = vmatpush3.bf16.msra.mxu0 (!%p388_p2), %v2295_v3  ;;  %v2311_v13 = vpack.c.bf16 (!%p388_p2), %v603_v12, %v602_v10  ;;  %v2315_v25 = vpack.c.bf16 (!%p388_p2), %v605_v24, %v604_v23  ;;  %v750_v26 = vld [vmem:[%s2963_s5] sm:$0xff] (!%p388_p2)  ;;  %v751_v27 = vld [vmem:[%s2963_s5 + $0x8] sm:$0xff] (!%p388_p2)  ;;  %v752_v28 = vld [vmem:[%s2963_s5 + $0x10] sm:$0xff] (!%p388_p2) }
   0xa   : > { %2300 = vmatprep.subr.bf16.mxu0 (!%p388_p2), %v2299_v7  ;;  %2308 = vmatprep.subr.bf16.mxu1 (!%p388_p2), %v2307_v11  ;;  %v2319_v29 = vpack.c.bf16 (!%p388_p2), %v751_v27, %v750_v26  ;;  %v753_v30 = vld [vmem:[%s2963_s5 + $0x18] sm:$0xff] (!%p388_p2)  ;;  %v1843_v32 = vld [vmem:[%s2960_s2] ss:$0 sm:$0xff] (!%p388_p2) }
   0xb   : > { %2310 = vmatpush3.bf16.msra.mxu1 (!%p388_p2), %v2307_v11  ;;  %v2323_v31 = vpack.c.bf16 (!%p388_p2), %v753_v30, %v752_v28  ;;  %v2600_v57 = vld [vmem:[%s2965_s7] sm:$0x1] (!%p388_p2) }
   0xc   : > { %2312 = vmatprep.subr.bf16.mxu1 (!%p388_p2), %v2311_v13  ;;  %900 = vrot.lane.b32.xlu0 (!%p388_p2), %v2600_v57, %s2440_s20  ;;  %v1852_v58 = vld [vmem:[%s2962_s4] ss:$0 sm:$0xff] (!%p388_p2) }
   0xd   : > { %s2973_s26 = smov (!%p431_p3, %s1835_s26), 1  ;;  %2302 = vmatpush3.bf16.msra.mxu0 %v2299_v7  ;;  %v1861_v23 = vld [vmem:[%s2964_s6] ss:$0 sm:$0xff] }
   0xe   : > { %s1924_s15 = sshll.u32 %s2973_s26, 6  ;;  %2304 = vmatprep.subr.bf16.mxu0 %v2303_v14  ;;  %s2359_s29 = smul.u32 104, %s2973_s26 }
   0xf   : > { %s435_s18 = scalar_lea.vmem %s2958_s0, %s1924_s15  ;;  %2314 = vmatpush3.bf16.msra.mxu1 %v2311_v13 }
  0x10   : > { %v441_v15 = vld [vmem:[%s435_s18] sm:$0xff]  ;;  %v442_v16 = vld [vmem:[%s435_s18 + $0x8] sm:$0xff]  ;;  %v443_v17 = vld [vmem:[%s435_s18 + $0x10] sm:$0xff]  ;;  %2316 = vmatprep.subr.bf16.mxu1 %v2315_v25  ;;  %s2929_s15 = scalar_lea.vmem %s2971_s13, %s2359_s29 }
  0x11   : > { %2047 = vmatprep.mubr.msk.f32.mxu0 %vm462_vm0, %v441_v15  ;;  %2306 = vmatpush3.bf16.msra.mxu0 %v2303_v14  ;;  %v444_v18 = vld [vmem:[%s435_s18 + $0x18] sm:$0xff]  ;;  %v445_v19 = vld [vmem:[%s435_s18 + $0x20] sm:$0xff]  ;;  %v446_v20 = vld [vmem:[%s435_s18 + $0x28] sm:$0xff] }
  0x12   : > { %v447_v21 = vld [vmem:[%s435_s18 + $0x30] sm:$0xff]  ;;  %v448_v22 = vld [vmem:[%s435_s18 + $0x38] sm:$0xff]  ;;  %2320 = vmatprep.subr.bf16.mxu0 %v2319_v29 }
  0x13   : > { %2318 = vmatpush3.bf16.msra.mxu1 %v2315_v25 }
  0x14   : > { %2048 = vmatmul.mubr.msk.f32.vlgmr.msra.gmra.mrb[0].mxu0 %vm462_vm0, %v442_v16 }
  0x15   : > { %2050 = vmatprep.mubr.msk.f32.mxu0 %vm462_vm0, %v443_v17  ;;  %2322 = vmatpush3.bf16.msra.mxu0 %v2319_v29 }
  0x16   : > { %2324 = vmatprep.subr.bf16.mxu0 %v2323_v31 }
  0x18   : > { %2051 = vmatmul.mubr.msk.f32.gmra.mrb[2].mxu0 %vm462_vm0, %v444_v18 }
  0x19   : > { %2053 = vmatprep.mubr.msk.f32.mxu0 %vm462_vm0, %v445_v19  ;;  %2326 = vmatpush3.bf16.msra.mxu0 %v2323_v31 }
  0x1c   : > { %2054 = vmatmul.mubr.msk.f32.gmra.mrb[4].mxu0 %vm462_vm0, %v446_v20  ;;  %v910_v20 = vlaneseq }
  0x1d   : > { %2056 = vmatprep.mubr.msk.f32.mxu0 %vm462_vm0, %v447_v21 }
  0x1e   : > { %v911_v21 = vshrl.u32 %v910_v20, 7 }
  0x20   : > { %2057 = vmatmul.mubr.msk.f32.gmra.mrb[6].mxu0 %vm462_vm0, %v448_v22  ;;  %v912_v22 = vsub.s32 0, %v911_v21  ;;  %v968_v21 = vld [vmem:[%s2966_s8 + $0x18] sm:$0xff] }
  0x22   : > { %v913_v25 = vrot.slane %v2600_v57, %v912_v22  ;;  %v967_v22 = vld [vmem:[%s2966_s8 + $0x10] sm:$0xff] }
  0x7e   : > { %v901_v19 = vpop.permute.xlu0 %900 }
  0x7f   : > { %2360 = vpush %v901_v19 }
  0xb0   : > { %s2361_s27 = spop %2360 }
  0xe7   : > { %v2049_v33 = vpop.f32.mrb[0].mxu0 }
  0xe8   : > { %v559_v34 = vadd.f32 %v2049_v33, %v1843_v32  ;;  %v553_v35 = vpop.f32.mrb[1].mxu0 }
  0xe9   : > { %v554_v36 = vadd.f32 %v1843_v32, %v553_v35 }
  0xea   : > { %v593_v39 = vmax.f32 %v559_v34, 0.0 }
  0xeb   : > { %v592_v37 = vmax.f32 %v554_v36, 0.0  ;;  %v2052_v38 = vpop.f32.mrb[2].mxu0 }
  0xec   : > { %v569_v40 = vadd.f32 %v2052_v38, %v1843_v32  ;;  %v563_v41 = vpop.f32.mrb[3].mxu0 }
  0xed   : > { %v564_v42 = vadd.f32 %v1843_v32, %v563_v41  ;;  %2071 = vmatprep.mubr.msk.f32.mxu1 %vm462_vm0, %v592_v37 }
  0xee   : > { %2072 = vmatmul.mubr.msk.f32.vlgmr.msra.gmra.mrb[0].mxu1 %vm462_vm0, %v593_v39  ;;  %v595_v45 = vmax.f32 %v569_v40, 0.0 }
  0xef   : > { %v594_v43 = vmax.f32 %v564_v42, 0.0  ;;  %v2055_v44 = vpop.f32.mrb[4].mxu0 }
  0xf0   : > { %v579_v46 = vadd.f32 %v2055_v44, %v1843_v32  ;;  %v573_v47 = vpop.f32.mrb[5].mxu0 }
  0xf1   : > { %v574_v48 = vadd.f32 %v1843_v32, %v573_v47  ;;  %2074 = vmatprep.mubr.msk.f32.mxu1 %vm462_vm0, %v594_v43 }
  0xf2   : > { %v597_v49 = vmax.f32 %v579_v46, 0.0  ;;  %2075 = vmatmul.mubr.msk.f32.gmra.mrb[2].mxu1 %vm462_vm0, %v595_v45 }
  0xf3   : > { %v596_v50 = vmax.f32 %v574_v48, 0.0  ;;  %v2058_v51 = vpop.f32.mrb[6].mxu0 }
  0xf4   : > { %v589_v52 = vadd.f32 %v2058_v51, %v1843_v32  ;;  %v583_v53 = vpop.f32.mrb[7].mxu0 }
  0xf5   : > { %2077 = vmatprep.mubr.msk.f32.mxu1 %vm462_vm0, %v596_v50  ;;  %v584_v54 = vadd.f32 %v1843_v32, %v583_v53 }
  0xf6   : > { %v599_v55 = vmax.f32 %v589_v52, 0.0  ;;  %2078 = vmatmul.mubr.msk.f32.gmra.mrb[4].mxu1 %vm462_vm0, %v597_v49 }
  0xf7   : > { %v598_v56 = vmax.f32 %v584_v54, 0.0 }
  0xf9   : > { %2080 = vmatprep.mubr.msk.f32.mxu1 %vm462_vm0, %v598_v56 }
  0xfa   : > { %2081 = vmatmul.mubr.msk.f32.gmra.mrb[6].mxu1 %vm462_vm0, %v599_v55 }
 0x1c1   : > { %v2073_v59 = vpop.f32.mrb[0].mxu1 }
 0x1c2   : > { %v709_v60 = vadd.f32 %v2073_v59, %v1852_v58  ;;  %v703_v61 = vpop.f32.mrb[1].mxu1 }
 0x1c3   : > { %v704_v62 = vadd.f32 %v1852_v58, %v703_v61 }
 0x1c4   : > { %v743_v1 = vmax.f32 %v709_v60, 0.0 }
 0x1c5   : > { %v742_v63 = vmax.f32 %v704_v62, 0.0  ;;  %v2076_v0 = vpop.f32.mrb[2].mxu1 }
 0x1c6   : > { %v719_v2 = vadd.f32 %v2076_v0, %v1852_v58  ;;  %v713_v3 = vpop.f32.mrb[3].mxu1 }
 0x1c7   : > { %v714_v4 = vadd.f32 %v1852_v58, %v713_v3  ;;  %2091 = vmatprep.mubr.msk.f32.mxu0 %vm761_vm1, %v742_v63  ;;  %v2443_v3 = vmov 0.0  }
 0x1c8   : > { %2092 = vmatmul.mubr.msk.f32.vlgmr.msra.gmra.mrb[8].mxu0 %vm761_vm1, %v743_v1  ;;  %v745_v7 = vmax.f32 %v719_v2, 0.0  ;;  %v2441_v1 = vmov 0.0|0.0   ;;  %2119 = vmatprep.mubr.msk.f32.mxu1 %vm2442_vm3, %v2443_v3 }
 0x1c9   : > { %v744_v5 = vmax.f32 %v714_v4, 0.0  ;;  %v2079_v6 = vpop.f32.mrb[4].mxu1  ;;  %2327 = vmatprep.subr.bf16.mxu1 %v2441_v1  ;;  %2339 = vmatprep.subr.bf16.mxu0 %v2441_v1  ;;  %v948_v4 = vstv %s2361_s27 }
 0x1ca   : > { %v729_v8 = vadd.f32 %v2079_v6, %v1852_v58  ;;  %v723_v9 = vpop.f32.mrb[5].mxu1 }
 0x1cb   : > { %v724_v10 = vadd.f32 %v1852_v58, %v723_v9  ;;  %2094 = vmatprep.mubr.msk.f32.mxu0 %vm761_vm1, %v744_v5 }
 0x1cc   : > { %v747_v11 = vmax.f32 %v729_v8, 0.0  ;;  %2095 = vmatmul.mubr.msk.f32.gmra.mrb[10].mxu0 %vm761_vm1, %v745_v7  ;;  %v966_v8 = vld [vmem:[%s2966_s8 + $0x8] sm:$0xff] }
 0x1cd   : > { %v746_v12 = vmax.f32 %v724_v10, 0.0  ;;  %v2082_v13 = vpop.f32.mrb[6].mxu1 }
 0x1ce   : > { %v739_v14 = vadd.f32 %v2082_v13, %v1852_v58  ;;  %v733_v15 = vpop.f32.mrb[7].mxu1 }
 0x1cf   : > { %2097 = vmatprep.mubr.msk.f32.mxu0 %vm761_vm1, %v746_v12  ;;  %v734_v16 = vadd.f32 %v1852_v58, %v733_v15 }
 0x1d0   : > { %v749_v17 = vmax.f32 %v739_v14, 0.0  ;;  %2098 = vmatmul.mubr.msk.f32.gmra.mrb[12].mxu0 %vm761_vm1, %v747_v11  ;;  %v965_v11 = vld [vmem:[%s2966_s8] sm:$0xff] }
 0x1d1   : > { %v748_v18 = vmax.f32 %v734_v16, 0.0 }
 0x1d3   : > { %2100 = vmatprep.mubr.msk.f32.mxu0 %vm761_vm1, %v748_v18 }
 0x1d4   : > { %2101 = vmatmul.mubr.msk.f32.gmra.mrb[14].mxu0 %vm761_vm1, %v749_v17 }
 0x1d5   : > { %2174 = vmatprep.mubr.msk.f32.mxu0 %vm2442_vm3, %v2443_v3 }
 0x29b   : > { %v2093_v24 = vpop.f32.mrb[8].mxu0 }
 0x29c   : > { %v858_v26 = vadd.f32 %v2093_v24, %v1861_v23  ;;  %v852_v27 = vpop.f32.mrb[9].mxu0 }
 0x29d   : > { %v853_v28 = vadd.f32 %v1861_v23, %v852_v27 }
 0x29e   : > { %v892_v29 = vmax.f32 %v858_v26, 0.0 }
 0x29f   : > { %v891_v30 = vmax.f32 %v853_v28, 0.0  ;;  %v2096_v31 = vpop.f32.mrb[10].mxu0 }
 0x2a0   : > { %v868_v32 = vadd.f32 %v2096_v31, %v1861_v23  ;;  %v862_v33 = vpop.f32.mrb[11].mxu0  ;;  %v916_v34 = vmul.f32 %v913_v25, %v892_v29 }
 0x2a1   : > { %v863_v35 = vadd.f32 %v1861_v23, %v862_v33  ;;  %v915_v36 = vmul.f32 %v913_v25, %v891_v30  ;;  %v969_v33 = vld [vmem:[%s2966_s8 + $0x20] sm:$0xff] }
 0x2a2   : > { %v894_v37 = vmax.f32 %v868_v32, 0.0  ;;  %v927_v38 = vsel %vm923_vm2, %v916_v34, 0.0  ;;  %v970_v32 = vld [vmem:[%s2966_s8 + $0x28] sm:$0xff] }
 0x2a3   : > { %v893_v39 = vmax.f32 %v863_v35, 0.0  ;;  %928 = vadd.xlane.f32.xlu1 %v927_v38  ;;  %v2099_v40 = vpop.f32.mrb[12].mxu0  ;;  %v924_v41 = vsel %vm923_vm2, %v915_v36, 0.0 }
 0x2a4   : > { %v878_v42 = vadd.f32 %v2099_v40, %v1861_v23  ;;  %v872_v43 = vpop.f32.mrb[13].mxu0  ;;  %925 = vadd.xlane.f32.xlu0 %v924_v41  ;;  %v918_v44 = vmul.f32 %v913_v25, %v894_v37 }
 0x2a5   : > { %v873_v46 = vadd.f32 %v1861_v23, %v872_v43  ;;  %v917_v48 = vmul.f32 %v913_v25, %v893_v39  ;;  %v971_v43 = vld [vmem:[%s2966_s8 + $0x30] sm:$0xff] }
 0x2a6   : > { %v896_v45 = vmax.f32 %v878_v42, 0.0  ;;  %v933_v47 = vsel %vm923_vm2, %v918_v44, 0.0  ;;  %v972_v44 = vld [vmem:[%s2966_s8 + $0x38] sm:$0xff] }
 0x2a7   : > { %934 = vadd.xlane.f32.xlu1 %v933_v47  ;;  %v2102_v49 = vpop.f32.mrb[14].mxu0  ;;  %v895_v51 = vmax.f32 %v873_v46, 0.0  ;;  %v930_v53 = vsel %vm923_vm2, %v917_v48, 0.0 }
 0x2a8   : > { %v882_v50 = vpop.f32.mrb[15].mxu0  ;;  %v920_v54 = vmul.f32 %v913_v25, %v896_v45  ;;  %v888_v55 = vadd.f32 %v2102_v49, %v1861_v23  ;;  %v981_v49 = vld [vmem:[%s2967_s9] sm:$0xff] }
 0x2a9   : > { %v883_v52 = vadd.f32 %v1861_v23, %v882_v50  ;;  %v919_v59 = vmul.f32 %v913_v25, %v895_v51  ;;  %v1164_v50 = vld [vmem:[%s2968_s10] sm:$0xff] }
 0x2aa   : > { %v939_v58 = vsel %vm923_vm2, %v920_v54, 0.0  ;;  %v898_v60 = vmax.f32 %v888_v55, 0.0  ;;  %v1530_v51 = vld [vmem:[%s2970_s12] sm:$0xff]  ;;  %v983_v54 = vld [vmem:[%s2967_s9 + $0x10] sm:$0xff] }
 0x2ab   : > { %931 = vadd.xlane.f32.xlu1 %v930_v53  ;;  %v897_v56 = vmax.f32 %v883_v52, 0.0  ;;  %v936_v61 = vsel %vm923_vm2, %v919_v59, 0.0  ;;  %v982_v52 = vld [vmem:[%s2967_s9 + $0x8] sm:$0xff]  ;;  %v1166_v55 = vld [vmem:[%s2968_s10 + $0x10] sm:$0xff]  ;;  %v985_v59 = vld [vmem:[%s2967_s9 + $0x20] sm:$0xff] }
 0x2ac   : > { %v922_v0 = vmul.f32 %v913_v25, %v898_v60  ;;  %v1165_v53 = vld [vmem:[%s2968_s10 + $0x8] sm:$0xff]  ;;  %v1168_v60 = vld [vmem:[%s2968_s10 + $0x20] sm:$0xff] }
 0x2ad   : > { %v921_v62 = vmul.f32 %v913_v25, %v897_v56  ;;  %v984_v56 = vld [vmem:[%s2967_s9 + $0x18] sm:$0xff] }
 0x2ae   : > { %v945_v2 = vsel %vm923_vm2, %v922_v0, 0.0  ;;  %v1170_v0 = vld [vmem:[%s2968_s10 + $0x30] sm:$0xff] }
 0x2af   : > { %940 = vadd.xlane.f32.xlu1 %v939_v58  ;;  %v942_v63 = vsel %vm923_vm2, %v921_v62, 0.0  ;;  %v1167_v58 = vld [vmem:[%s2968_s10 + $0x18] sm:$0xff]  ;;  %v1169_v62 = vld [vmem:[%s2968_s10 + $0x28] sm:$0xff] }
 0x2b3   : > { %937 = vadd.xlane.f32.xlu1 %v936_v61  ;;  %v986_v61 = vld [vmem:[%s2967_s9 + $0x28] sm:$0xff] }
 0x2b7   : > { %943 = vadd.xlane.f32.xlu1 %v942_v63  ;;  %v987_v63 = vld [vmem:[%s2967_s9 + $0x30] sm:$0xff] }
 0x2ba   : > { %906 = vrot.lane.b32.xlu0 %v2600_v57, %s2445_s24 }
 0x2bb   : > { %946 = vadd.xlane.f32.xlu1 %v945_v2  ;;  %v1171_v2 = vld [vmem:[%s2968_s10 + $0x38] sm:$0xff] }
 0x2cc   : > { %903 = vrot.lane.b32.xlu1 %v2600_v57, %s2444_s23 }
 0x330   : > { %v929_v5 = vpop.xlane.xlu1 %928 }
 0x331   : > { %v950_v6 = vadd.f32 %v948_v4, %v929_v5  ;;  %v926_v7 = vpop.xlane.xlu0 %925  ;;  %v1172_v5 = vld [vmem:[%s2968_s10 + $0x40] sm:$0xff] }
 0x332   : > { %v949_v9 = vadd.f32 %v948_v4, %v926_v7  ;;  %v1173_v7 = vld [vmem:[%s2968_s10 + $0x48] sm:$0xff] }
 0x333   : > { %v958_v10 = vmax.f32 %v950_v6, 0.0  ;;  %v990_v6 = vld [vmem:[%s2967_s9 + $0x48] sm:$0xff] }
 0x334   : > { %v957_v12 = vmax.f32 %v949_v9, 0.0  ;;  %v935_v13 = vpop.xlane.xlu1 %934  ;;  %v1174_v9 = vld [vmem:[%s2968_s10 + $0x50] sm:$0xff] }
 0x335   : > { %v974_v14 = vmul.f32 %v966_v8, %v958_v10  ;;  %v952_v15 = vadd.f32 %v948_v4, %v935_v13  ;;  %v991_v8 = vld [vmem:[%s2967_s9 + $0x50] sm:$0xff]  ;;  %v992_v10 = vld [vmem:[%s2967_s9 + $0x58] sm:$0xff]  ;;  %v1176_v13 = vld [vmem:[%s2968_s10 + $0x60] sm:$0xff] }
 0x336   : > { %v973_v16 = vmul.f32 %v965_v11, %v957_v12  ;;  %v993_v11 = vld [vmem:[%s2967_s9 + $0x60] sm:$0xff]  ;;  %v1175_v12 = vld [vmem:[%s2968_s10 + $0x58] sm:$0xff] }
 0x337   : > { %v960_v19 = vmax.f32 %v952_v15, 0.0 }
 0x338   : > { %v2328_v17 = vpack.c.bf16 %v974_v14, %v973_v16  ;;  %v932_v18 = vpop.xlane.xlu1 %931  ;;  %v1359_v14 = vld [vmem:[%s2969_s11] sm:$0xff] }
 0x339   : > { %v951_v20 = vadd.f32 %v948_v4, %v932_v18  ;;  %v976_v25 = vmul.f32 %v968_v21, %v960_v19 }
 0x33a   : > { %2329 = vmatpush3.bf16.msra.mxu1 %v2328_v17  ;;  %2341 = vmatpush3.bf16.msra.mxu0 %v2328_v17 }
 0x33b   : > { %v959_v23 = vmax.f32 %v951_v20, 0.0  ;;  %2330 = vmatprep.subr.bf16.mxu1 %v2441_v1  ;;  %2342 = vmatprep.subr.bf16.mxu0 %v2441_v1 }
 0x33c   : > { %v941_v24 = vpop.xlane.xlu1 %940 }
 0x33d   : > { %v975_v26 = vmul.f32 %v967_v22, %v959_v23  ;;  %v954_v27 = vadd.f32 %v948_v4, %v941_v24 }
 0x33f   : > { %v2331_v28 = vpack.c.bf16 %v976_v25, %v975_v26  ;;  %v962_v30 = vmax.f32 %v954_v27, 0.0 }
 0x340   : > { %v938_v29 = vpop.xlane.xlu1 %937 }
 0x341   : > { %v953_v31 = vadd.f32 %v948_v4, %v938_v29  ;;  %2332 = vmatpush3.bf16.msra.mxu1 %v2331_v28  ;;  %2344 = vmatpush3.bf16.msra.mxu0 %v2331_v28  ;;  %v978_v36 = vmul.f32 %v970_v32, %v962_v30 }
 0x342   : > { %2333 = vmatprep.subr.bf16.mxu1 %v2441_v1  ;;  %2345 = vmatprep.subr.bf16.mxu0 %v2441_v1 }
 0x343   : > { %v961_v34 = vmax.f32 %v953_v31, 0.0 }
 0x344   : > { %v944_v35 = vpop.xlane.xlu1 %943 }
 0x345   : > { %v977_v37 = vmul.f32 %v969_v33, %v961_v34  ;;  %v955_v38 = vadd.f32 %v948_v4, %v944_v35 }
 0x347   : > { %v2334_v39 = vpack.c.bf16 %v978_v36, %v977_v37  ;;  %v963_v41 = vmax.f32 %v955_v38, 0.0 }
 0x348   : > { %v947_v40 = vpop.xlane.xlu1 %946 }
 0x349   : > { %v956_v42 = vadd.f32 %v948_v4, %v947_v40  ;;  %2335 = vmatpush3.bf16.msra.mxu1 %v2334_v39  ;;  %2347 = vmatpush3.bf16.msra.mxu0 %v2334_v39  ;;  %v979_v46 = vmul.f32 %v971_v43, %v963_v41  ;;  %v989_v4 = vld [vmem:[%s2967_s9 + $0x40] sm:$0xff] }
 0x34a   : > { %2336 = vmatprep.subr.bf16.mxu1 %v2441_v1  ;;  %2348 = vmatprep.subr.bf16.mxu0 %v2441_v1 }
 0x34b   : > { %v964_v45 = vmax.f32 %v956_v42, 0.0 }
 0x34d   : > { %v980_v47 = vmul.f32 %v972_v44, %v964_v45 }
 0x34f   : > { %v2337_v48 = vpack.c.bf16 %v980_v47, %v979_v46 }
 0x351   : > { %2338 = vmatpush3.bf16.msra.mxu1 %v2337_v48  ;;  %2350 = vmatpush3.bf16.msra.mxu0 %v2337_v48 }
 0x352   : > { %2351 = vmatprep.subr.bf16.mxu1 %v2441_v1  ;;  %2254 = vmatprep.subr.mxu0 %v2443_v3 }
 0x354   : > { %2120 = vmatmul.mubr.msk.f32.vlgmr.msra.gmra.mrb[8].mxu1 %vm994_vm4, %v981_v49  ;;  %2175 = vmatmul.mubr.msk.f32.vlgmr.msra.gmra.mrb[16].mxu0 %vm994_vm4, %v1164_v50 }
 0x355   : > { %2355 = vmatpush3.bf16.msra.mxu1 %v2328_v17  ;;  %2122 = vmatprep.mubr.msk.f32.mxu1 %vm2442_vm3, %v2443_v3 }
 0x356   : > { %2177 = vmatprep.mubr.msk.f32.mxu0 %vm2442_vm3, %v2443_v3  ;;  %2352 = vmatprep.subr.bf16.mxu1 %v2441_v1 }
 0x357   : > { %2255 = vmatpush3.msra.mxu0 %v1530_v51 }
 0x358   : > { %2123 = vmatmul.mubr.msk.f32.gmra.mrb[10].mxu1 %vm994_vm4, %v982_v52  ;;  %2178 = vmatmul.mubr.msk.f32.gmra.mrb[18].mxu0 %vm994_vm4, %v1165_v53 }
 0x359   : > { %2356 = vmatpush3.bf16.msra.mxu1 %v2331_v28  ;;  %2125 = vmatprep.mubr.msk.f32.mxu1 %vm2442_vm3, %v2443_v3 }
 0x35a   : > { %2180 = vmatprep.mubr.msk.f32.mxu0 %vm2442_vm3, %v2443_v3  ;;  %2353 = vmatprep.subr.bf16.mxu1 %v2441_v1 }
 0x35c   : > { %2126 = vmatmul.mubr.msk.f32.gmra.mrb[12].mxu1 %vm994_vm4, %v983_v54  ;;  %2181 = vmatmul.mubr.msk.f32.gmra.mrb[20].mxu0 %vm994_vm4, %v1166_v55 }
 0x35d   : > { %2357 = vmatpush3.bf16.msra.mxu1 %v2334_v39  ;;  %2128 = vmatprep.mubr.msk.f32.mxu1 %vm2442_vm3, %v2443_v3 }
 0x35e   : > { %2183 = vmatprep.mubr.msk.f32.mxu0 %vm2442_vm3, %v2443_v3  ;;  %2354 = vmatprep.subr.bf16.mxu1 %v2441_v1  ;;  %v988_v1 = vld [vmem:[%s2967_s9 + $0x38] sm:$0xff] }
 0x360   : > { %2129 = vmatmul.mubr.msk.f32.gmra.mrb[14].mxu1 %vm994_vm4, %v984_v56  ;;  %2184 = vmatmul.mubr.msk.f32.gmra.mrb[22].mxu0 %vm994_vm4, %v1167_v58 }
 0x361   : > { %2358 = vmatpush3.bf16.msra.mxu1 %v2337_v48  ;;  %2131 = vmatprep.mubr.msk.f32.mxu1 %vm2442_vm3, %v2443_v3 }
 0x362   : > { %2186 = vmatprep.mubr.msk.f32.mxu0 %vm2442_vm3, %v2443_v3  ;;  %2213 = vmatprep.subr.mxu1 %v2443_v3 }
 0x364   : > { %2132 = vmatmul.mubr.msk.f32.gmra.mrb[16].mxu1 %vm994_vm4, %v985_v59  ;;  %2187 = vmatmul.mubr.msk.f32.gmra.mrb[24].mxu0 %vm994_vm4, %v1168_v60 }
 0x365   : > { %2134 = vmatprep.mubr.msk.f32.mxu1 %vm2442_vm3, %v2443_v3  ;;  %2189 = vmatprep.mubr.msk.f32.mxu0 %vm2442_vm3, %v2443_v3 }
 0x368   : > { %2135 = vmatmul.mubr.msk.f32.gmra.mrb[18].mxu1 %vm994_vm4, %v986_v61  ;;  %2190 = vmatmul.mubr.msk.f32.gmra.mrb[26].mxu0 %vm994_vm4, %v1169_v62 }
 0x369   : > { %2137 = vmatprep.mubr.msk.f32.mxu1 %vm2442_vm3, %v2443_v3  ;;  %2192 = vmatprep.mubr.msk.f32.mxu0 %vm2442_vm3, %v2443_v3 }
 0x36c   : > { %2138 = vmatmul.mubr.msk.f32.gmra.mrb[20].mxu1 %vm994_vm4, %v987_v63  ;;  %2193 = vmatmul.mubr.msk.f32.gmra.mrb[28].mxu0 %vm994_vm4, %v1170_v0 }
 0x36d   : > { %2140 = vmatprep.mubr.msk.f32.mxu1 %vm2442_vm3, %v2443_v3  ;;  %2195 = vmatprep.mubr.msk.f32.mxu0 %vm2442_vm3, %v2443_v3 }
 0x370   : > { %2141 = vmatmul.mubr.msk.f32.gmra.mrb[22].mxu1 %vm994_vm4, %v988_v1  ;;  %2196 = vmatmul.mubr.msk.f32.gmra.mrb[30].mxu0 %vm994_vm4, %v1171_v2  ;;  %v904_v1 = vpop.permute.xlu1 %903  ;;  %v907_v2 = vpop.permute.xlu0 %906 }
 0x371   : > { %2143 = vmatprep.mubr.msk.f32.mxu1 %vm2442_vm3, %v2443_v3  ;;  %2198 = vmatprep.mubr.msk.f32.mxu0 %vm2442_vm3, %v2443_v3  ;;  %2362 = vpush %v904_v1 }
 0x372   : > { %2364 = vpush %v907_v2 }
 0x374   : > { %2144 = vmatmul.mubr.msk.f32.gmra.mrb[24].mxu1 %vm994_vm4, %v989_v4  ;;  %2199 = vmatmul.mubr.msk.f32.gmra.mrb[32].mxu0 %vm994_vm4, %v1172_v5 }
 0x375   : > { %2146 = vmatprep.mubr.msk.f32.mxu1 %vm2442_vm3, %v2443_v3  ;;  %2201 = vmatprep.mubr.msk.f32.mxu0 %vm2442_vm3, %v2443_v3 }
 0x378   : > { %2147 = vmatmul.mubr.msk.f32.gmra.mrb[26].mxu1 %vm994_vm4, %v990_v6  ;;  %2202 = vmatmul.mubr.msk.f32.gmra.mrb[34].mxu0 %vm994_vm4, %v1173_v7 }
 0x379   : > { %2149 = vmatprep.mubr.msk.f32.mxu1 %vm2442_vm3, %v2443_v3  ;;  %2204 = vmatprep.mubr.msk.f32.mxu0 %vm2442_vm3, %v2443_v3 }
 0x37c   : > { %2150 = vmatmul.mubr.msk.f32.gmra.mrb[28].mxu1 %vm994_vm4, %v991_v8  ;;  %2205 = vmatmul.mubr.msk.f32.gmra.mrb[36].mxu0 %vm994_vm4, %v1174_v9 }
 0x37d   : > { %2152 = vmatprep.mubr.msk.f32.mxu1 %vm2442_vm3, %v2443_v3  ;;  %2256 = vmatprep.mubr.msk.f32.mxu0 %vm2442_vm3, %v2443_v3 }
 0x380   : > { %2153 = vmatmul.mubr.msk.f32.gmra.mrb[30].mxu1 %vm994_vm4, %v992_v10 }
 0x381   : > { %2155 = vmatprep.mubr.msk.f32.mxu1 %vm2442_vm3, %v2443_v3 }
 0x384   : > { %2156 = vmatmul.mubr.msk.f32.gmra.mrb[32].mxu1 %vm994_vm4, %v993_v11 }
 0x385   : > { %2207 = vmatprep.mubr.msk.f32.mxu1 %vm2442_vm3, %v2443_v3 }
 0x388   : > { %2208 = vmatmul.mubr.msk.f32.vlgmr.msra.gmra.mrb[34].mxu1 %vm994_vm4, %v1175_v12 }
 0x389   : > { %2210 = vmatprep.mubr.msk.f32.mxu1 %vm2442_vm3, %v2443_v3  ;;  %2214 = vmatpush3.msra.mxu1 %v1359_v14 }
 0x38c   : > { %2211 = vmatmul.mubr.msk.f32.gmra.mrb[36].mxu1 %vm994_vm4, %v1176_v13 }
 0x38d   : > { %2215 = vmatprep.mubr.msk.f32.mxu1 %vm2442_vm3, %v2443_v3 }
 0x3a2   : > { %s2363_s27 = spop %2362 }
 0x3a3   : > { %s2365_s28 = spop %2364 }
 0x427   : > { %v1100_v15 = vpop.f32.mrb[8].mxu1  ;;  %v1282_v16 = vpop.f32.mrb[16].mxu0 }
 0x428   : > { %v1346_v17 = vmax.f32 %v1100_v15, %v1282_v16  ;;  %v2121_v18 = vpop.f32.mrb[9].mxu1  ;;  %v2176_v19 = vpop.f32.mrb[17].mxu0 }
 0x42a   : > { %2216 = vmatmul.mubr.msk.f32.vlgmr.msra.gmra.mrb[38].mxu1 %vm1360_vm5, %v1346_v17  ;;  %2257 = vmatmul.mubr.msk.f32.vlgmr.msra.gmra.mrb[38].mxu0 %vm1360_vm5, %v1346_v17 }
 0x42b   : > { %v1105_v20 = vpop.f32.mrb[10].mxu1  ;;  %v1287_v21 = vpop.f32.mrb[18].mxu0  ;;  %2218 = vmatprep.mubr.msk.f32.mxu1 %vm2442_vm3, %v2443_v3  ;;  %2259 = vmatprep.mubr.msk.f32.mxu0 %vm2442_vm3, %v2443_v3 }
 0x42c   : > { %v1347_v22 = vmax.f32 %v1105_v20, %v1287_v21  ;;  %v2124_v57 = vpop.f32.mrb[11].mxu1  ;;  %v2179_v23 = vpop.f32.mrb[19].mxu0  ;;  %v2906_v21 = vstv %s2363_s27 }
 0x42e   : > { %2219 = vmatmul.mubr.msk.f32.gmra.mrb[40].mxu1 %vm1360_vm5, %v1347_v22  ;;  %2260 = vmatmul.mubr.msk.f32.gmra.mrb[40].mxu0 %vm1360_vm5, %v1347_v22 }
 0x42f   : > { %v1110_v24 = vpop.f32.mrb[12].mxu1  ;;  %v1292_v25 = vpop.f32.mrb[20].mxu0  ;;  %2221 = vmatprep.mubr.msk.f32.mxu1 %vm2442_vm3, %v2443_v3  ;;  %2262 = vmatprep.mubr.msk.f32.mxu0 %vm2442_vm3, %v2443_v3 }
 0x430   : > { %v1348_v26 = vmax.f32 %v1110_v24, %v1292_v25  ;;  %v2127_v27 = vpop.f32.mrb[13].mxu1  ;;  %v2182_v28 = vpop.f32.mrb[21].mxu0  ;;  %v2908_v24 = vstv %s2365_s28 }
 0x432   : > { %2222 = vmatmul.mubr.msk.f32.gmra.mrb[42].mxu1 %vm1360_vm5, %v1348_v26  ;;  %2263 = vmatmul.mubr.msk.f32.gmra.mrb[42].mxu0 %vm1360_vm5, %v1348_v26 }
 0x433   : > { %v1115_v29 = vpop.f32.mrb[14].mxu1  ;;  %v1297_v30 = vpop.f32.mrb[22].mxu0  ;;  %2224 = vmatprep.mubr.msk.f32.mxu1 %vm2442_vm3, %v2443_v3  ;;  %2265 = vmatprep.mubr.msk.f32.mxu0 %vm2442_vm3, %v2443_v3 }
 0x434   : > { %v1349_v31 = vmax.f32 %v1115_v29, %v1297_v30  ;;  %v2130_v32 = vpop.f32.mrb[15].mxu1  ;;  %v2185_v33 = vpop.f32.mrb[23].mxu0 }
 0x436   : > { %2225 = vmatmul.mubr.msk.f32.gmra.mrb[44].mxu1 %vm1360_vm5, %v1349_v31  ;;  %2266 = vmatmul.mubr.msk.f32.gmra.mrb[44].mxu0 %vm1360_vm5, %v1349_v31 }
 0x437   : > { %v1120_v34 = vpop.f32.mrb[16].mxu1  ;;  %v1302_v35 = vpop.f32.mrb[24].mxu0  ;;  %2227 = vmatprep.mubr.msk.f32.mxu1 %vm2442_vm3, %v2443_v3  ;;  %2268 = vmatprep.mubr.msk.f32.mxu0 %vm2442_vm3, %v2443_v3 }
 0x438   : > { %v1350_v36 = vmax.f32 %v1120_v34, %v1302_v35  ;;  %v2133_v37 = vpop.f32.mrb[17].mxu1  ;;  %v2188_v38 = vpop.f32.mrb[25].mxu0 }
 0x43a   : > { %2228 = vmatmul.mubr.msk.f32.gmra.mrb[46].mxu1 %vm1360_vm5, %v1350_v36  ;;  %2269 = vmatmul.mubr.msk.f32.gmra.mrb[46].mxu0 %vm1360_vm5, %v1350_v36 }
 0x43b   : > { %v1125_v39 = vpop.f32.mrb[18].mxu1  ;;  %v1307_v40 = vpop.f32.mrb[26].mxu0  ;;  %2230 = vmatprep.mubr.msk.f32.mxu1 %vm2442_vm3, %v2443_v3  ;;  %2271 = vmatprep.mubr.msk.f32.mxu0 %vm2442_vm3, %v2443_v3 }
 0x43c   : > { %v1351_v41 = vmax.f32 %v1125_v39, %v1307_v40  ;;  %v2136_v42 = vpop.f32.mrb[19].mxu1  ;;  %v2191_v43 = vpop.f32.mrb[27].mxu0 }
 0x43e   : > { %2231 = vmatmul.mubr.msk.f32.gmra.mrb[48].mxu1 %vm1360_vm5, %v1351_v41  ;;  %2272 = vmatmul.mubr.msk.f32.gmra.mrb[48].mxu0 %vm1360_vm5, %v1351_v41 }
 0x43f   : > { %v1130_v44 = vpop.f32.mrb[20].mxu1  ;;  %v1312_v45 = vpop.f32.mrb[28].mxu0  ;;  %2233 = vmatprep.mubr.msk.f32.mxu1 %vm2442_vm3, %v2443_v3  ;;  %2274 = vmatprep.mubr.msk.f32.mxu0 %vm2442_vm3, %v2443_v3 }
 0x440   : > { %v1352_v46 = vmax.f32 %v1130_v44, %v1312_v45  ;;  %v2139_v47 = vpop.f32.mrb[21].mxu1  ;;  %v2194_v48 = vpop.f32.mrb[29].mxu0 }
 0x442   : > { %2234 = vmatmul.mubr.msk.f32.gmra.mrb[50].mxu1 %vm1360_vm5, %v1352_v46  ;;  %2275 = vmatmul.mubr.msk.f32.gmra.mrb[50].mxu0 %vm1360_vm5, %v1352_v46 }
 0x443   : > { %v1135_v49 = vpop.f32.mrb[22].mxu1  ;;  %v1317_v50 = vpop.f32.mrb[30].mxu0  ;;  %2236 = vmatprep.mubr.msk.f32.mxu1 %vm2442_vm3, %v2443_v3  ;;  %2277 = vmatprep.mubr.msk.f32.mxu0 %vm2442_vm3, %v2443_v3 }
 0x444   : > { %v1353_v51 = vmax.f32 %v1135_v49, %v1317_v50  ;;  %v2142_v52 = vpop.f32.mrb[23].mxu1  ;;  %v2197_v53 = vpop.f32.mrb[31].mxu0 }
 0x446   : > { %2237 = vmatmul.mubr.msk.f32.gmra.mrb[52].mxu1 %vm1360_vm5, %v1353_v51  ;;  %2278 = vmatmul.mubr.msk.f32.gmra.mrb[52].mxu0 %vm1360_vm5, %v1353_v51 }
 0x447   : > { %v1140_v54 = vpop.f32.mrb[24].mxu1  ;;  %v1322_v55 = vpop.f32.mrb[32].mxu0  ;;  %2239 = vmatprep.mubr.msk.f32.mxu1 %vm2442_vm3, %v2443_v3  ;;  %2280 = vmatprep.mubr.msk.f32.mxu0 %vm2442_vm3, %v2443_v3 }
 0x448   : > { %v1354_v56 = vmax.f32 %v1140_v54, %v1322_v55  ;;  %v2145_v58 = vpop.f32.mrb[25].mxu1  ;;  %v2200_v59 = vpop.f32.mrb[33].mxu0 }
 0x44a   : > { %2240 = vmatmul.mubr.msk.f32.gmra.mrb[54].mxu1 %vm1360_vm5, %v1354_v56  ;;  %2281 = vmatmul.mubr.msk.f32.gmra.mrb[54].mxu0 %vm1360_vm5, %v1354_v56 }
 0x44b   : > { %v1145_v60 = vpop.f32.mrb[26].mxu1  ;;  %v1327_v61 = vpop.f32.mrb[34].mxu0  ;;  %2242 = vmatprep.mubr.msk.f32.mxu1 %vm2442_vm3, %v2443_v3  ;;  %2283 = vmatprep.mubr.msk.f32.mxu0 %vm2442_vm3, %v2443_v3 }
 0x44c   : > { %v1355_v62 = vmax.f32 %v1145_v60, %v1327_v61  ;;  %v2148_v63 = vpop.f32.mrb[27].mxu1  ;;  %v2203_v0 = vpop.f32.mrb[35].mxu0 }
 0x44e   : > { %2243 = vmatmul.mubr.msk.f32.gmra.mrb[56].mxu1 %vm1360_vm5, %v1355_v62  ;;  %2284 = vmatmul.mubr.msk.f32.gmra.mrb[56].mxu0 %vm1360_vm5, %v1355_v62 }
 0x44f   : > { %v1150_v4 = vpop.f32.mrb[28].mxu1  ;;  %v1332_v5 = vpop.f32.mrb[36].mxu0  ;;  %2245 = vmatprep.mubr.msk.f32.mxu1 %vm2442_vm3, %v2443_v3  ;;  %2286 = vmatprep.mubr.msk.f32.mxu0 %vm2442_vm3, %v2443_v3 }
 0x450   : > { %v1356_v6 = vmax.f32 %v1150_v4, %v1332_v5  ;;  %v2151_v7 = vpop.f32.mrb[29].mxu1  ;;  %v2206_v8 = vpop.f32.mrb[37].mxu0 }
 0x452   : > { %2246 = vmatmul.mubr.msk.f32.gmra.mrb[58].mxu1 %vm1360_vm5, %v1356_v6  ;;  %2287 = vmatmul.mubr.msk.f32.gmra.mrb[58].mxu0 %vm1360_vm5, %v1356_v6 }
 0x453   : > { %v1155_v9 = vpop.f32.mrb[30].mxu1  ;;  %2248 = vmatprep.mubr.msk.f32.mxu1 %vm2442_vm3, %v2443_v3  ;;  %2289 = vmatprep.mubr.msk.f32.mxu0 %vm2442_vm3, %v2443_v3 }
 0x454   : > { %v2154_v10 = vpop.f32.mrb[31].mxu1 }
 0x457   : > { %v1160_v11 = vpop.f32.mrb[32].mxu1 }
 0x458   : > { %v2157_v12 = vpop.f32.mrb[33].mxu1 }
 0x45b   : > { %v1337_v13 = vpop.f32.mrb[34].mxu1 }
 0x45c   : > { %v1357_v14 = vmax.f32 %v1155_v9, %v1337_v13  ;;  %v2209_v15 = vpop.f32.mrb[35].mxu1 }
 0x45e   : > { %2249 = vmatmul.mubr.msk.f32.gmra.mrb[60].mxu1 %vm1360_vm5, %v1357_v14  ;;  %2290 = vmatmul.mubr.msk.f32.gmra.mrb[60].mxu0 %vm1360_vm5, %v1357_v14 }
 0x45f   : > { %v1342_v16 = vpop.f32.mrb[36].mxu1  ;;  %2251 = vmatprep.mubr.msk.f32.mxu1 %vm2442_vm3, %v2443_v3  ;;  %2292 = vmatprep.mubr.msk.f32.mxu0 %vm2442_vm3, %v2443_v3 }
 0x460   : > { %v1358_v17 = vmax.f32 %v1160_v11, %v1342_v16  ;;  %v2212_v18 = vpop.f32.mrb[37].mxu1 }
 0x462   : > { %2252 = vmatmul.mubr.msk.f32.gmra.mrb[62].mxu1 %vm1360_vm5, %v1358_v17  ;;  %2293 = vmatmul.mubr.msk.f32.gmra.mrb[62].mxu0 %vm1360_vm5, %v1358_v17 }
 0x4fd   : > { %v1466_v19 = vpop.f32.mrb[38].mxu1  ;;  %v1597_v20 = vpop.f32.mrb[38].mxu0 }
 0x4fe   : > { %v1661_v22 = vmax.f32 %v1466_v19, %v1597_v20  ;;  %v2217_v57 = vpop.f32.mrb[39].mxu1  ;;  %v2258_v23 = vpop.f32.mrb[39].mxu0 }
 0x500   : > { %v1675_v25 = vmul.f32 %v2906_v21, %v1661_v22 }
 0x501   : > { %v1471_v3 = vpop.f32.mrb[40].mxu1  ;;  %v1602_v26 = vpop.f32.mrb[40].mxu0 }
 0x502   : > { %v1689_v27 = vadd.f32 %v2908_v24, %v1675_v25  ;;  %v1662_v28 = vmax.f32 %v1471_v3, %v1602_v26  ;;  %v2220_v29 = vpop.f32.mrb[41].mxu1  ;;  %v2261_v30 = vpop.f32.mrb[41].mxu0 }
 0x504   : > { %v1702_v31 = vsub.f32 0.0, %v1689_v27  ;;  %v1676_v32 = vmul.f32 %v2906_v21, %v1662_v28 }
 0x505   : > { %v1476_v33 = vpop.f32.mrb[42].mxu1  ;;  %v1607_v34 = vpop.f32.mrb[42].mxu0 }
 0x506   : > { %v1715_v35 = vmul.f32 1.442695, %v1702_v31  ;;  %v1690_v36 = vadd.f32 %v2908_v24, %v1676_v32  ;;  %v1663_v37 = vmax.f32 %v1476_v33, %v1607_v34  ;;  %v2223_v38 = vpop.f32.mrb[43].mxu1  ;;  %v2264_v39 = vpop.f32.mrb[43].mxu0 }
 0x508   : > { %2380 = vpow2.f32 %v1715_v35  ;;  %v1703_v40 = vsub.f32 0.0, %v1690_v36  ;;  %v1677_v41 = vmul.f32 %v2906_v21, %v1663_v37 }
 0x509   : > { %v1481_v42 = vpop.f32.mrb[44].mxu1  ;;  %v1612_v43 = vpop.f32.mrb[44].mxu0 }
 0x50a   : > { %v1717_v44 = vmul.f32 1.442695, %v1703_v40  ;;  %v1691_v45 = vadd.f32 %v2908_v24, %v1677_v41  ;;  %v1664_v46 = vmax.f32 %v1481_v42, %v1612_v43  ;;  %v2226_v47 = vpop.f32.mrb[45].mxu1  ;;  %v2267_v48 = vpop.f32.mrb[45].mxu0 }
 0x50c   : > { %2382 = vpow2.f32 %v1717_v44  ;;  %v1704_v49 = vsub.f32 0.0, %v1691_v45  ;;  %v1678_v50 = vmul.f32 %v2906_v21, %v1664_v46 }
 0x50d   : > { %v1486_v51 = vpop.f32.mrb[46].mxu1  ;;  %v1617_v52 = vpop.f32.mrb[46].mxu0 }
 0x50e   : > { %v1719_v53 = vmul.f32 1.442695, %v1704_v49  ;;  %v1692_v54 = vadd.f32 %v2908_v24, %v1678_v50  ;;  %v1665_v55 = vmax.f32 %v1486_v51, %v1617_v52  ;;  %v2229_v56 = vpop.f32.mrb[47].mxu1  ;;  %v2270_v58 = vpop.f32.mrb[47].mxu0 }
 0x510   : > { %2384 = vpow2.f32 %v1719_v53  ;;  %v1705_v59 = vsub.f32 0.0, %v1692_v54  ;;  %v1679_v60 = vmul.f32 %v2906_v21, %v1665_v55 }
 0x511   : > { %v1491_v61 = vpop.f32.mrb[48].mxu1  ;;  %v1622_v62 = vpop.f32.mrb[48].mxu0 }
 0x512   : > { %v2381_v63 = vpop.eup %2380  ;;  %v1721_v0 = vmul.f32 1.442695, %v1705_v59  ;;  %v1693_v1 = vadd.f32 %v2908_v24, %v1679_v60  ;;  %v1666_v2 = vmax.f32 %v1491_v61, %v1622_v62  ;;  %v2232_v4 = vpop.f32.mrb[49].mxu1 }
 0x513   : > { %v2273_v5 = vpop.f32.mrb[49].mxu0  ;;  %v1741_v6 = vadd.f32 1.0, %v2381_v63 }
 0x514   : > { %2386 = vpow2.f32 %v1721_v0  ;;  %v1706_v7 = vsub.f32 0.0, %v1693_v1  ;;  %v1680_v8 = vmul.f32 %v2906_v21, %v1666_v2 }
 0x515   : > { %2388 = vrcp.f32 %v1741_v6  ;;  %v1496_v9 = vpop.f32.mrb[50].mxu1  ;;  %v1627_v10 = vpop.f32.mrb[50].mxu0 }
 0x516   : > { %v2383_v11 = vpop.eup %2382  ;;  %v1723_v12 = vmul.f32 1.442695, %v1706_v7  ;;  %v1694_v13 = vadd.f32 %v2908_v24, %v1680_v8  ;;  %v1667_v14 = vmax.f32 %v1496_v9, %v1627_v10  ;;  %v2235_v15 = vpop.f32.mrb[51].mxu1 }
 0x517   : > { %v2276_v16 = vpop.f32.mrb[51].mxu0  ;;  %v1742_v17 = vadd.f32 1.0, %v2383_v11 }
 0x518   : > { %2390 = vpow2.f32 %v1723_v12  ;;  %v1707_v18 = vsub.f32 0.0, %v1694_v13  ;;  %v1681_v19 = vmul.f32 %v2906_v21, %v1667_v14 }
 0x519   : > { %2392 = vrcp.f32 %v1742_v17  ;;  %v1501_v20 = vpop.f32.mrb[52].mxu1  ;;  %v1632_v22 = vpop.f32.mrb[52].mxu0 }
 0x51a   : > { %v2385_v57 = vpop.eup %2384  ;;  %v1725_v23 = vmul.f32 1.442695, %v1707_v18  ;;  %v1695_v25 = vadd.f32 %v2908_v24, %v1681_v19  ;;  %v1668_v3 = vmax.f32 %v1501_v20, %v1632_v22  ;;  %v2238_v26 = vpop.f32.mrb[53].mxu1 }
 0x51b   : > { %v2279_v27 = vpop.f32.mrb[53].mxu0  ;;  %v1743_v28 = vadd.f32 1.0, %v2385_v57 }
 0x51c   : > { %2394 = vpow2.f32 %v1725_v23  ;;  %v1708_v29 = vsub.f32 0.0, %v1695_v25  ;;  %v1682_v30 = vmul.f32 %v2906_v21, %v1668_v3 }
 0x51d   : > { %2396 = vrcp.f32 %v1743_v28  ;;  %v1506_v31 = vpop.f32.mrb[54].mxu1  ;;  %v1637_v32 = vpop.f32.mrb[54].mxu0 }
 0x51e   : > { %v2387_v33 = vpop.eup %2386  ;;  %v1727_v34 = vmul.f32 1.442695, %v1708_v29  ;;  %v1696_v35 = vadd.f32 %v2908_v24, %v1682_v30  ;;  %v1669_v36 = vmax.f32 %v1506_v31, %v1637_v32  ;;  %v2241_v37 = vpop.f32.mrb[55].mxu1 }
 0x51f   : > { %v2282_v38 = vpop.f32.mrb[55].mxu0  ;;  %v2389_v39 = vpop.eup %2388  ;;  %v1744_v40 = vadd.f32 1.0, %v2387_v33 }
 0x520   : > { %1767 = vst [vmem:[%s2929_s15] sm:$0xff] %v2389_v39  ;;  %2398 = vpow2.f32 %v1727_v34  ;;  %v1709_v41 = vsub.f32 0.0, %v1696_v35  ;;  %v1683_v42 = vmul.f32 %v2906_v21, %v1669_v36 }
 0x521   : > { %2400 = vrcp.f32 %v1744_v40  ;;  %v1511_v43 = vpop.f32.mrb[56].mxu1  ;;  %v1642_v44 = vpop.f32.mrb[56].mxu0 }
 0x522   : > { %v2391_v45 = vpop.eup %2390  ;;  %v1729_v46 = vmul.f32 1.442695, %v1709_v41  ;;  %v1697_v47 = vadd.f32 %v2908_v24, %v1683_v42  ;;  %v1670_v48 = vmax.f32 %v1511_v43, %v1642_v44  ;;  %v2244_v49 = vpop.f32.mrb[57].mxu1 }
 0x523   : > { %v2285_v50 = vpop.f32.mrb[57].mxu0  ;;  %v2393_v51 = vpop.eup %2392  ;;  %v1745_v52 = vadd.f32 1.0, %v2391_v45 }
 0x524   : > { %1768 = vst [vmem:[%s2929_s15 + $0x8] sm:$0xff] %v2393_v51  ;;  %2402 = vpow2.f32 %v1729_v46  ;;  %v1710_v53 = vsub.f32 0.0, %v1697_v47  ;;  %v1684_v54 = vmul.f32 %v2906_v21, %v1670_v48 }
 0x525   : > { %2404 = vrcp.f32 %v1745_v52  ;;  %v1516_v55 = vpop.f32.mrb[58].mxu1  ;;  %v1647_v56 = vpop.f32.mrb[58].mxu0 }
 0x526   : > { %v2395_v58 = vpop.eup %2394  ;;  %v1731_v59 = vmul.f32 1.442695, %v1710_v53  ;;  %v1698_v60 = vadd.f32 %v2908_v24, %v1684_v54  ;;  %v1671_v61 = vmax.f32 %v1516_v55, %v1647_v56  ;;  %v2247_v62 = vpop.f32.mrb[59].mxu1 }
 0x527   : > { %v2288_v63 = vpop.f32.mrb[59].mxu0  ;;  %v2397_v0 = vpop.eup %2396  ;;  %v1746_v1 = vadd.f32 1.0, %v2395_v58 }
 0x528   : > { %1769 = vst [vmem:[%s2929_s15 + $0x10] sm:$0xff] %v2397_v0  ;;  %2406 = vpow2.f32 %v1731_v59  ;;  %v1711_v2 = vsub.f32 0.0, %v1698_v60  ;;  %v1685_v4 = vmul.f32 %v2906_v21, %v1671_v61 }
 0x529   : > { %2408 = vrcp.f32 %v1746_v1 }
 0x52a   : > { %v2399_v5 = vpop.eup %2398  ;;  %v1733_v6 = vmul.f32 1.442695, %v1711_v2  ;;  %v1699_v7 = vadd.f32 %v2908_v24, %v1685_v4 }
 0x52b   : > { %v2401_v8 = vpop.eup %2400  ;;  %v1747_v9 = vadd.f32 1.0, %v2399_v5 }
 0x52c   : > { %1770 = vst [vmem:[%s2929_s15 + $0x18] sm:$0xff] %v2401_v8  ;;  %2410 = vpow2.f32 %v1733_v6  ;;  %v1712_v10 = vsub.f32 0.0, %v1699_v7 }
 0x52d   : > { %2412 = vrcp.f32 %v1747_v9 }
 0x52e   : > { %v2403_v11 = vpop.eup %2402  ;;  %v1735_v12 = vmul.f32 1.442695, %v1712_v10 }
 0x52f   : > { %v2405_v13 = vpop.eup %2404  ;;  %v1748_v14 = vadd.f32 1.0, %v2403_v11 }
 0x530   : > { %1771 = vst [vmem:[%s2929_s15 + $0x20] sm:$0xff] %v2405_v13  ;;  %2414 = vpow2.f32 %v1735_v12 }
 0x531   : > { %2416 = vrcp.f32 %v1748_v14  ;;  %v1521_v15 = vpop.f32.mrb[60].mxu1  ;;  %v1652_v16 = vpop.f32.mrb[60].mxu0 }
 0x532   : > { %v2407_v17 = vpop.eup %2406  ;;  %v1672_v18 = vmax.f32 %v1521_v15, %v1652_v16  ;;  %v2250_v19 = vpop.f32.mrb[61].mxu1 }
 0x533   : > { %v2291_v20 = vpop.f32.mrb[61].mxu0  ;;  %v2409_v22 = vpop.eup %2408  ;;  %v1749_v57 = vadd.f32 1.0, %v2407_v17 }
 0x534   : > { %1772 = vst [vmem:[%s2929_s15 + $0x28] sm:$0xff] %v2409_v22  ;;  %v1686_v23 = vmul.f32 %v2906_v21, %v1672_v18 }
 0x535   : > { %2418 = vrcp.f32 %v1749_v57  ;;  %v1526_v25 = vpop.f32.mrb[62].mxu1  ;;  %v1657_v3 = vpop.f32.mrb[62].mxu0 }
 0x536   : > { %v2411_v26 = vpop.eup %2410  ;;  %v1700_v27 = vadd.f32 %v2908_v24, %v1686_v23  ;;  %v1673_v28 = vmax.f32 %v1526_v25, %v1657_v3  ;;  %v2253_v29 = vpop.f32.mrb[63].mxu1 }
 0x537   : > { %v2294_v30 = vpop.f32.mrb[63].mxu0  ;;  %v2413_v31 = vpop.eup %2412  ;;  %v1750_v32 = vadd.f32 1.0, %v2411_v26 }
 0x538   : > { %1773 = vst [vmem:[%s2929_s15 + $0x30] sm:$0xff] %v2413_v31  ;;  %v1713_v33 = vsub.f32 0.0, %v1700_v27  ;;  %v1687_v34 = vmul.f32 %v2906_v21, %v1673_v28 }
 0x539   : > { %2420 = vrcp.f32 %v1750_v32 }
 0x53a   : > { %v2415_v35 = vpop.eup %2414  ;;  %v1737_v36 = vmul.f32 1.442695, %v1713_v33  ;;  %v1701_v37 = vadd.f32 %v2908_v24, %v1687_v34 }
 0x53b   : > { %v2417_v38 = vpop.eup %2416  ;;  %v1751_v39 = vadd.f32 1.0, %v2415_v35 }
 0x53c   : > { %1774 = vst [vmem:[%s2929_s15 + $0x38] sm:$0xff] %v2417_v38  ;;  %2422 = vpow2.f32 %v1737_v36  ;;  %v1714_v40 = vsub.f32 0.0, %v1701_v37 }
 0x53d   : > { %2424 = vrcp.f32 %v1751_v39 }
 0x53e   : > { %v1739_v41 = vmul.f32 1.442695, %v1714_v40 }
 0x53f   : > { %v2419_v42 = vpop.eup %2418 }
 0x540   : > { %1775 = vst [vmem:[%s2929_s15 + $0x40] sm:$0xff] %v2419_v42  ;;  %2426 = vpow2.f32 %v1739_v41 }
 0x543   : > { %v2421_v21 = vpop.eup %2420 }
 0x544   : > { %1776 = vst [vmem:[%s2929_s15 + $0x48] sm:$0xff] %v2421_v21 }
 0x546   : > { %v2423_v43 = vpop.eup %2422 }
 0x547   : > { %v2425_v44 = vpop.eup %2424  ;;  %v1752_v45 = vadd.f32 1.0, %v2423_v43 }
 0x548   : > { %1777 = vst [vmem:[%s2929_s15 + $0x50] sm:$0xff] %v2425_v44 }
 0x549   : > { %2428 = vrcp.f32 %v1752_v45 }
 0x54a   : > { %v2427_v24 = vpop.eup %2426 }
 0x54b   : > { %v1753_v46 = vadd.f32 1.0, %v2427_v24 }
 0x54d   : > { %2430 = vrcp.f32 %v1753_v46 }
 0x553   : > { %v2429_v47 = vpop.eup %2428 }
 0x554   : > { %1778 = vst [vmem:[%s2929_s15 + $0x58] sm:$0xff] %v2429_v47 }
 0x557   : > { %v2431_v48 = vpop.eup %2430 }
 0x558   : > { %1779 = vst [vmem:[%s2929_s15 + $0x60] sm:$0xff] %v2431_v48 }
 0x559 PF: > { %s23_s25 = sadd.s32 1, %s2438_s25  }
 0x55a   : > { %p20_p4 = scmp.ge.s32.totalorder %s23_s25, 4  }
 0x55c   :  { %22 = sbr.rel (!%p20_p4) target bundleno = 1 (0x1), region = 102 }

</bundles_post_ra>
